<compile_context>
chip_gen: v6e
topology: v6e:2x2x1
jax: 0.10.0
libtpu: 0.0.40
codegen_flags: <defaults>
</compile_context>

<pallas_src>
import functools

import jax
import jax.numpy as jnp
from jax.experimental import pallas as pl
from jax.experimental.pallas import tpu as pltpu


def _round_up(v, m):
    return -(-v // m) * m


def _pick_tile_hw(hw, c, itemsize, target_bytes=6 * 1024 * 1024):
    """Spatial (lane-axis) tile: whole HW if small, else ~target_bytes per buffer,
    aligned to the 128-lane width."""
    c_pad = _round_up(c, 8)
    if c_pad * _round_up(hw, 128) * itemsize <= target_bytes:
        return int(hw)
    t = (target_bytes // (c_pad * itemsize)) // 128 * 128
    return int(max(128, min(t, hw)))


def _vmem_limit_bytes(c, c_hid, tile_hw, x_item, w_item):
    """Rough padded VMEM working set (double-buffered) + headroom."""
    c8 = _round_up(c, 8)
    tile = c8 * _round_up(tile_hw, 128) * x_item
    w = (_round_up(c_hid, 8) * _round_up(c, 128) + c8 * 128) * w_item
    out = c8 * 128 * x_item
    scratch = 2 * c8 * 128 * 4
    need = 2 * tile + 2 * w + 2 * out + scratch
    return int(max(need + (2 << 20), 16 << 20))


def _make_kernel(hw, tile_hw):
    n_k = pl.cdiv(hw, tile_hw)
    needs_mask = (hw % tile_hw) != 0
    rem = hw - (n_k - 1) * tile_hw          # valid lanes in the last tile (static)
    inv_hw = 1.0 / float(hw)

    def kernel(x_ref, w1_ref, w2_ref, out_ref, sum_acc, max_acc):
        # x_ref:   (1, C, tile_hw)  one batch element, one spatial tile (HW on lanes)
        # w1_ref:  (C_hid, C)       fc1 weight, PyTorch layout (resident)
        # w2_ref:  (C, C_hid)       fc2 weight, PyTorch layout (resident)
        # out_ref: (1, C, 1)
        # sum_acc/max_acc: (1, C, 1) f32 running accumulators (VMEM scratch)
        k = pl.program_id(1)
        last = pl.num_programs(1) - 1

        @pl.when(k == 0)
        def _init():
            sum_acc[...] = jnp.zeros_like(sum_acc)
            max_acc[...] = jnp.full_like(max_acc, -jnp.inf)

        def accumulate(masked):
            xt = x_ref[...]                                   # keep input dtype
            if masked:
                lane = jax.lax.broadcasted_iota(jnp.int32, (1, 1, tile_hw), 2)
                inb = lane < rem                              # static remainder
                x_s = jnp.where(inb, xt, jnp.array(0.0, dtype=xt.dtype))
                x_m = jnp.where(inb, xt, jnp.array(-jnp.inf, dtype=xt.dtype))
            else:
                x_s = xt
                x_m = xt
            # Lane reductions over the spatial tile, accumulated in f32.
            sum_acc[...] += jnp.sum(x_s, axis=-1, keepdims=True, dtype=jnp.float32)
            max_acc[...] = jnp.maximum(
                max_acc[...],
                jnp.max(x_m, axis=-1, keepdims=True).astype(jnp.float32))

        if needs_mask:
            @pl.when(k < last)
            def _full_tiles():         # hot path: pure unmasked stream
                accumulate(False)

            @pl.when(k == last)
            def _partial_tile():       # only the final tile pays the mask cost
                accumulate(True)
        else:
            accumulate(False)

        @pl.when(k == last)
        def _finish():
            avg = sum_acc[...][0] * inv_hw                    # (C, 1) f32
            mx = max_acc[...][0]                              # (C, 1) f32
            pooled = jnp.concatenate([avg, mx], axis=-1)      # (C, 2) fused branches
            w1 = w1_ref[...].astype(jnp.float32)              # (C_hid, C)
            w2 = w2_ref[...].astype(jnp.float32)              # (C, C_hid)
            h = jnp.maximum(
                jnp.dot(w1, pooled, preferred_element_type=jnp.float32), 0.0)
            o = jnp.dot(w2, h, preferred_element_type=jnp.float32)   # (C, 2)
            att = jax.nn.sigmoid(o[:, 0:1] + o[:, 1:2])               # (C, 1)
            out_ref[...] = att[None].astype(out_ref.dtype)            # (1, C, 1)

    return kernel


@functools.partial(jax.jit, static_argnames=("tile_hw",))
def channel_attention(x, w1, w2, *, tile_hw=None):
    """x: (N, C, H, W) NCHW. w1: (C_hid, C), w2: (C, C_hid) (PyTorch 1x1-conv weights,
    squeezed). Returns the channel-attention map, shape (N, C, 1, 1)."""
    N, C, H, W = x.shape
    C_hid = w1.shape[0]
    HW = H * W

    # Free reshape for contiguous NCHW -- no extra HBM pass (the old transpose
    # read+wrote all of x before the kernel even ran).
    x3 = x.reshape(N, C, HW)

    if tile_hw is None:
        tile_hw = _pick_tile_hw(HW, C, x3.dtype.itemsize)
    tile_hw = int(min(tile_hw, HW))
    k_hw = pl.cdiv(HW, tile_hw)

    grid_spec = pltpu.PrefetchScalarGridSpec(
        num_scalar_prefetch=0,
        grid=(N, k_hw),
        in_specs=[
            pl.BlockSpec((1, C, tile_hw), lambda n, k: (n, 0, k)),
            pl.BlockSpec((C_hid, C), lambda n, k: (0, 0)),   # resident weights
            pl.BlockSpec((C, C_hid), lambda n, k: (0, 0)),
        ],
        out_specs=pl.BlockSpec((1, C, 1), lambda n, k: (n, 0, 0)),
        scratch_shapes=[
            pltpu.VMEM((1, C, 1), jnp.float32),  # running sum
            pltpu.VMEM((1, C, 1), jnp.float32),  # running max
        ],
    )

    cost = pl.CostEstimate(
        flops=2 * N * HW * C + 8 * N * C * C_hid,
        transcendentals=N * C,
        bytes_accessed=x3.size * x3.dtype.itemsize
        + w1.size * w1.dtype.itemsize
        + w2.size * w2.dtype.itemsize
        + N * C * x.dtype.itemsize,
    )

    out = pl.pallas_call(
        _make_kernel(HW, tile_hw),
        out_shape=jax.ShapeDtypeStruct((N, C, 1), x.dtype),
        grid_spec=grid_spec,
        compiler_params=pltpu.CompilerParams(
            dimension_semantics=("parallel", "arbitrary"),
            vmem_limit_bytes=_vmem_limit_bytes(
                C, C_hid, tile_hw, x3.dtype.itemsize, w1.dtype.itemsize),
        ),
        cost_estimate=cost,
    )(x3, w1, w2)

    return out[..., None]                      # (N, C, 1, 1)


def _reference(x, w1, w2):
    # Pure-JAX reference mirroring the PyTorch forward (PyTorch weight layout).
    avg = jnp.mean(x, axis=(2, 3))  # (N, C)
    mx = jnp.max(x, axis=(2, 3))    # (N, C)

    def mlp(p):
        h = jnp.maximum(p @ w1.T, 0.0)
        return h @ w2.T

    out = jax.nn.sigmoid(mlp(avg) + mlp(mx))
    return out[:, :, None, None]


if __name__ == "__main__":
    # in_planes must be >= 16 since the module hardcodes `in_planes // 16`.
    N, C, H, W = 2, 32, 16, 16
    C_hid = C // 16

    key = jax.random.PRNGKey(0)
    kx, k1, k2, kx2 = jax.random.split(key, 4)
    x = jax.random.normal(kx, (N, C, H, W), dtype=jnp.float32)
    # Deterministic synthetic weights for fc1 / fc2 (1x1 convs, no bias),
    # in PyTorch layout: fc1 (C_hid, C), fc2 (C, C_hid).
    w1 = jax.random.normal(k1, (C_hid, C), dtype=jnp.float32) * 0.1
    w2 = jax.random.normal(k2, (C, C_hid), dtype=jnp.float32) * 0.1

    # 1) Default tiling (whole HW fits one tile at this small size).
    ref = _reference(x, w1, w2)
    out = channel_attention(x, w1, w2)
    jax.block_until_ready(out)
    assert out.shape == (N, C, 1, 1)
    assert jnp.allclose(out, ref, atol=1e-5, rtol=1e-5)

    # 2) Multi-tile accumulation + partial-last-tile masking:
    #    HW = 18*18 = 324 with tile_hw = 128 -> 3 tiles, remainder 68.
    x2 = jax.random.normal(kx2, (N, C, 18, 18), dtype=jnp.float32)
    ref2 = _reference(x2, w1, w2)
    out2 = channel_attention(x2, w1, w2, tile_hw=128)
    jax.block_until_ready(out2)
    assert jnp.allclose(out2, ref2, atol=1e-5, rtol=1e-5)

    # 3) bf16 input: same f32 accumulation, half the HBM traffic.
    xb = x.astype(jnp.bfloat16)
    refb = _reference(xb.astype(jnp.float32), w1, w2)
    outb = channel_attention(xb, w1, w2)
    jax.block_until_ready(outb)
    assert jnp.allclose(outb.astype(jnp.float32), refb, atol=1e-2, rtol=1e-2)

    print("KERNEL_OK")
</pallas_src>

<mosaic_0001>
module attributes {stable_mosaic.version = 11 : i64} {
  func.func @kernel(%arg0: i32, %arg1: i32, %arg2: memref<1x32x256xf32, #tpu.memory_space<vmem>>, %arg3: memref<2x32xf32, #tpu.memory_space<vmem>>, %arg4: memref<32x2xf32, #tpu.memory_space<vmem>>, %arg5: memref<1x32x1xf32, #tpu.memory_space<vmem>>, %arg6: memref<1x32x1xf32, #tpu.memory_space<vmem>>, %arg7: memref<1x32x1xf32, #tpu.memory_space<vmem>>) attributes {dimension_semantics = [#tpu.dimension_semantics<parallel>, #tpu.dimension_semantics<arbitrary>], iteration_bounds = array<i64: 2, 1>, scalar_prefetch = 0 : i64, scratch_operands = 2 : i64, tpu.core_type = #tpu.core_type<tc>, window_params = [{transform_indices = @transform_0, window_bounds = array<i64: 1, 32, 256>}, {pipeline_mode = #tpu.pipeline_mode<synchronous>, transform_indices = @transform_1, window_bounds = array<i64: 2, 32>}, {pipeline_mode = #tpu.pipeline_mode<synchronous>, transform_indices = @transform_2, window_bounds = array<i64: 32, 2>}, {transform_indices = @transform_3, window_bounds = array<i64: 1, 32, 1>}]} {
    %c0_i32 = arith.constant 0 : i32
    %0 = arith.cmpi eq, %arg1, %c0_i32 : i32
    %1 = arith.extui %0 : i1 to i32
    %c0_i32_0 = arith.constant 0 : i32
    %2 = arith.cmpi ne, %1, %c0_i32_0 : i32
    scf.if %2 {
      %cst_18 = arith.constant 0.000000e+00 : f32
      %17 = vector.broadcast %cst_18 : f32 to vector<1x32x1xf32>
      %c0_19 = arith.constant 0 : index
      %c0_20 = arith.constant 0 : index
      %c0_21 = arith.constant 0 : index
      %18 = vector.load %arg6[%c0_19, %c0_20, %c0_21] : memref<1x32x1xf32, #tpu.memory_space<vmem>>, vector<1x32x1xf32>
      tpu.vector_store %arg6[%c0_19, %c0_20, %c0_21], %17 {strides = array<i32>} : memref<1x32x1xf32, #tpu.memory_space<vmem>>, vector<1x32x1xf32>,
      %cst_22 = arith.constant 0xFF800000 : f32
      %19 = vector.broadcast %cst_22 : f32 to vector<1x32x1xf32>
      %c0_23 = arith.constant 0 : index
      %c0_24 = arith.constant 0 : index
      %c0_25 = arith.constant 0 : index
      %20 = vector.load %arg7[%c0_23, %c0_24, %c0_25] : memref<1x32x1xf32, #tpu.memory_space<vmem>>, vector<1x32x1xf32>
      tpu.vector_store %arg7[%c0_23, %c0_24, %c0_25], %19 {strides = array<i32>} : memref<1x32x1xf32, #tpu.memory_space<vmem>>, vector<1x32x1xf32>,
    } else {
    }
    %c0 = arith.constant 0 : index
    %c0_1 = arith.constant 0 : index
    %c0_2 = arith.constant 0 : index
    %3 = vector.load %arg2[%c0, %c0_1, %c0_2] : memref<1x32x256xf32, #tpu.memory_space<vmem>>, vector<1x32x256xf32>
    %c0_3 = arith.constant 0 : index
    %c0_4 = arith.constant 0 : index
    %c0_5 = arith.constant 0 : index
    %4 = vector.load %arg6[%c0_3, %c0_4, %c0_5] : memref<1x32x1xf32, #tpu.memory_space<vmem>>, vector<1x32x1xf32>
    %cst = arith.constant dense<0.000000e+00> : vector<1x32xf32>
    %5 = vector.multi_reduction <add>, %3, %cst [2] : vector<1x32x256xf32> to vector<1x32xf32>
    %6 = vector.shape_cast %5 : vector<1x32xf32> to vector<1x32x1xf32>
    %7 = arith.addf %4, %6 : vector<1x32x1xf32>
    %c0_6 = arith.constant 0 : index
    %c0_7 = arith.constant 0 : index
    %c0_8 = arith.constant 0 : index
    %8 = vector.load %arg6[%c0_6, %c0_7, %c0_8] : memref<1x32x1xf32, #tpu.memory_space<vmem>>, vector<1x32x1xf32>
    tpu.vector_store %arg6[%c0_6, %c0_7, %c0_8], %7 {strides = array<i32>} : memref<1x32x1xf32, #tpu.memory_space<vmem>>, vector<1x32x1xf32>,
    %c0_9 = arith.constant 0 : index
    %c0_10 = arith.constant 0 : index
    %c0_11 = arith.constant 0 : index
    %9 = vector.load %arg7[%c0_9, %c0_10, %c0_11] : memref<1x32x1xf32, #tpu.memory_space<vmem>>, vector<1x32x1xf32>
    %cst_12 = arith.constant dense<0xFF800000> : vector<1x32xf32>
    %10 = vector.multi_reduction <maximumf>, %3, %cst_12 [2] : vector<1x32x256xf32> to vector<1x32xf32>
    %11 = vector.shape_cast %10 : vector<1x32xf32> to vector<1x32x1xf32>
    %12 = arith.maximumf %9, %11 : vector<1x32x1xf32>
    %c0_13 = arith.constant 0 : index
    %c0_14 = arith.constant 0 : index
    %c0_15 = arith.constant 0 : index
    %13 = vector.load %arg7[%c0_13, %c0_14, %c0_15] : memref<1x32x1xf32, #tpu.memory_space<vmem>>, vector<1x32x1xf32>
    tpu.vector_store %arg7[%c0_13, %c0_14, %c0_15], %12 {strides = array<i32>} : memref<1x32x1xf32, #tpu.memory_space<vmem>>, vector<1x32x1xf32>,
    %c0_i32_16 = arith.constant 0 : i32
    %14 = arith.cmpi eq, %arg1, %c0_i32_16 : i32
    %15 = arith.extui %14 : i1 to i32
    %c0_i32_17 = arith.constant 0 : i32
    %16 = arith.cmpi ne, %15, %c0_i32_17 : i32
    scf.if %16 {
      %c0_18 = arith.constant 0 : index
      %c0_19 = arith.constant 0 : index
      %c0_20 = arith.constant 0 : index
      %17 = vector.load %arg6[%c0_18, %c0_19, %c0_20] : memref<1x32x1xf32, #tpu.memory_space<vmem>>, vector<1x32x1xf32>
      %18 = vector.shape_cast %17 : vector<1x32x1xf32> to vector<32x1xf32>
      %cst_21 = arith.constant 3.906250e-03 : f32
      %19 = vector.broadcast %cst_21 : f32 to vector<32x1xf32>
      %20 = arith.mulf %18, %19 : vector<32x1xf32>
      %c0_22 = arith.constant 0 : index
      %c0_23 = arith.constant 0 : index
      %c0_24 = arith.constant 0 : index
      %21 = vector.load %arg7[%c0_22, %c0_23, %c0_24] : memref<1x32x1xf32, #tpu.memory_space<vmem>>, vector<1x32x1xf32>
      %22 = vector.shape_cast %21 : vector<1x32x1xf32> to vector<32x1xf32>
      %23 = tpu.concatenate %20, %22 in 1 : vector<32x1xf32>, vector<32x1xf32> -> vector<32x2xf32>
      %c0_25 = arith.constant 0 : index
      %c0_26 = arith.constant 0 : index
      %24 = vector.load %arg3[%c0_25, %c0_26] : memref<2x32xf32, #tpu.memory_space<vmem>>, vector<2x32xf32>
      %c0_27 = arith.constant 0 : index
      %c0_28 = arith.constant 0 : index
      %25 = vector.load %arg4[%c0_27, %c0_28] : memref<32x2xf32, #tpu.memory_space<vmem>>, vector<32x2xf32>
      %cst_29 = arith.constant dense<0.000000e+00> : vector<2x2xf32>
      %26 = tpu.matmul %24, %23, %cst_29 {dimension_numbers = #tpu.dot_dimension_numbers<[1], [0], [0], [1], [0, 0, 1, 1], [], []>} : vector<2x32xf32>, vector<32x2xf32>, vector<2x2xf32> -> vector<2x2xf32>
      %cst_30 = arith.constant 0.000000e+00 : f32
      %27 = vector.broadcast %cst_30 : f32 to vector<2x2xf32>
      %28 = arith.maximumf %26, %27 : vector<2x2xf32>
      %cst_31 = arith.constant dense<0.000000e+00> : vector<32x2xf32>
      %29 = tpu.matmul %25, %28, %cst_31 {dimension_numbers = #tpu.dot_dimension_numbers<[1], [0], [0], [1], [0, 0, 1, 1], [], []>} : vector<32x2xf32>, vector<2x2xf32>, vector<32x2xf32> -> vector<32x2xf32>
      %30 = vector.extract_strided_slice %29 {offsets = [0, 0], sizes = [32, 1], strides = [1, 1]} : vector<32x2xf32> to vector<32x1xf32>
      %31 = vector.extract_strided_slice %29 {offsets = [0, 1], sizes = [32, 1], strides = [1, 1]} : vector<32x2xf32> to vector<32x1xf32>
      %32 = arith.addf %30, %31 : vector<32x1xf32>
      %33 = arith.negf %32 : vector<32x1xf32>
      %34 = math.exp %33 : vector<32x1xf32>
      %cst_32 = arith.constant 1.000000e+00 : f32
      %35 = vector.broadcast %cst_32 : f32 to vector<32x1xf32>
      %36 = arith.addf %35, %34 : vector<32x1xf32>
      %37 = arith.divf %35, %36 : vector<32x1xf32>
      %38 = vector.shape_cast %37 : vector<32x1xf32> to vector<1x32x1xf32>
      %c0_33 = arith.constant 0 : index
      %c0_34 = arith.constant 0 : index
      %c0_35 = arith.constant 0 : index
      %39 = vector.load %arg5[%c0_33, %c0_34, %c0_35] : memref<1x32x1xf32, #tpu.memory_space<vmem>>, vector<1x32x1xf32>
      tpu.vector_store %arg5[%c0_33, %c0_34, %c0_35], %38 {strides = array<i32>} : memref<1x32x1xf32, #tpu.memory_space<vmem>>, vector<1x32x1xf32>,
    } else {
    }
    return
  }
  func.func @transform_0(%arg0: i32, %arg1: i32) -> (i32, i32, i32) {
    %c0_i32 = arith.constant 0 : i32
    %c0_i32_0 = arith.constant 0 : i32
    return %arg0, %c0_i32, %arg1 : i32, i32, i32
  }
  func.func @transform_1(%arg0: i32, %arg1: i32) -> (i32, i32) {
    %c0_i32 = arith.constant 0 : i32
    %c0_i32_0 = arith.constant 0 : i32
    %c0_i32_1 = arith.constant 0 : i32
    return %c0_i32, %c0_i32_0 : i32, i32
  }
  func.func @transform_2(%arg0: i32, %arg1: i32) -> (i32, i32) {
    %c0_i32 = arith.constant 0 : i32
    %c0_i32_0 = arith.constant 0 : i32
    %c0_i32_1 = arith.constant 0 : i32
    return %c0_i32, %c0_i32_0 : i32, i32
  }
  func.func @transform_3(%arg0: i32, %arg1: i32) -> (i32, i32, i32) {
    %c0_i32 = arith.constant 0 : i32
    %c0_i32_0 = arith.constant 0 : i32
    %c0_i32_1 = arith.constant 0 : i32
    return %arg0, %c0_i32, %c0_i32_0 : i32, i32, i32
  }
}

</mosaic_0001>

<bundles_post_ra>
// kernel: channel_attention.1
= control target key start
LH: loop header
LB: loop body
LE: loop exit
PB: predicated region body
PF: predicated region fallthrough
CT: control target
= control target key end

     0   :  { %s749_s12 = smov 0   ;;  %s751_s13 = smov 0   ;;  %s834_s0 = inlined_call_operand.vmem [shape: f32[2,32,256], index: 0, kind: input, shape index: {}]   ;;  %s835_s1 = inlined_call_operand.vmem [shape: f32[2,32], index: 1, kind: input, shape index: {}]   ;;  %s836_s2 = inlined_call_operand.vmem [shape: f32[32,2], index: 2, kind: input, shape index: {}]   ;;  %s837_s3 = inlined_call_operand.vmem [shape: f32[2,32,1], index: 3, kind: output, shape index: {}]  }
   0x1   :  { %s753_s14 = smov 0  }
   0x2 LB: > { %s25_s15 = sadd.s32 1, %s718_s13  ;;  %p607_p0 = scmp.ge.s32.totalorder %s722_s14, 1  ;;  %s722_s14 = sphi %s753_s14, %s13_s14   ;;  %s718_s13 = sphi %s751_s13, %s839_s13   ;;  %s714_s12 = sphi %s749_s12, %s838_s12  }
   0x3   : > { %p27_p1 = scmp.ge.s32.totalorder %s25_s15, 2  ;;  %p156_p2 = scmp.lt.s32.totalorder %s722_s14, 3 }
   0x5   : > { %s841_s15 = smov (%p27_p1, %s25_s15), 0  ;;  %p157_p3 = pnand %p607_p0, %p156_p2 }
   0x6   : > { %p185_p4 = scmp.lt.s32.totalorder (!%p157_p3), %s714_s12, 1  ;;  %s726_s20 = smov (!%p157_p3), 1  }
   0x7   : > { %160 = sbr.rel (%p157_p3) target bundleno = 841 (0x349), region = 32  ;;  %s728_s4 = smov (!%p157_p3), 127  }
   0xc   : > { %vm203_vm0 = vcmask 7168   ;;  %v724_v0 = vmov -inf   ;;  %s843_s12 = smov (!%p185_p4, %s714_s12), 1  ;;  %v725_v17 = vmov 0.0   ;;  %vm727_vm1 = vmmov 0   ;;  %v305_v63 = vld [vmem:[%s836_s2] sm:$0xff] }
   0xd   : > { %211 = vst.msk [vmem:[#allocation3 + $0x18] sm:$0xff] %vm203_vm0, %v724_v0  ;;  %208 = vst.msk [vmem:[#allocation3] sm:$0xff] %vm203_vm0, %v724_v0  ;;  %s624_s16 = sshll.u32 %s843_s12, 6  ;;  %636 = vmatprep.subr.mxu0 %v725_v17  ;;  %644 = vmatprep.mubr.msk.f32.mxu0 %vm727_vm1, %v725_v17  ;;  %v304_v61 = vld [vmem:[%s835_s1] sm:$0x3]  ;;  %vm309_vm2 = vcmask 261120  }
   0xe   : > { %209 = vst.msk [vmem:[#allocation3 + $0x8] sm:$0xff] %vm203_vm0, %v724_v0  ;;  %210 = vst.msk [vmem:[#allocation3 + $0x10] sm:$0xff] %vm203_vm0, %v724_v0  ;;  %s192_s19 = scalar_lea.vmem %s834_s0, %s624_s16  ;;  %vm384_vm3 = vcmask 15360   ;;  %vm397_vm4 = vcmask 1041408   ;;  %s625_s5 = sshll.u32 %s843_s12, 5 }
   0xf   : > { %v218_v1 = vld [vmem:[%s192_s19 + $0x30] sm:$0xff]  ;;  %v219_v2 = vld [vmem:[%s192_s19 + $0x38] sm:$0xff]  ;;  %v216_v3 = vld [vmem:[%s192_s19 + $0x20] sm:$0xff]  ;;  %207 = vst.msk [vmem:[#allocation2 + $0x18] sm:$0xff] %vm203_vm0, %v725_v17  ;;  %649 = vmatprep.mubr.msk.f32.mxu1 %vm384_vm3, %v305_v63  ;;  %s198_s8 = scalar_lea.vmem %s837_s3, %s625_s5 }
  0x10   : > { %v258_v4 = vmax.f32 %v218_v1, %v219_v2  ;;  %v217_v5 = vld [vmem:[%s192_s19 + $0x28] sm:$0xff]  ;;  %v214_v6 = vld [vmem:[%s192_s19 + $0x10] sm:$0xff]  ;;  %v215_v7 = vld [vmem:[%s192_s19 + $0x18] sm:$0xff]  ;;  %v233_v13 = vadd.f32 %v219_v2, %v218_v1  ;;  %204 = vst.msk [vmem:[#allocation2] sm:$0xff] %vm203_vm0, %v725_v17 }
  0x11   : > { %v252_v8 = vmax.f32 %v214_v6, %v215_v7  ;;  %v212_v9 = vld [vmem:[%s192_s19] sm:$0xff]  ;;  %v213_v10 = vld [vmem:[%s192_s19 + $0x8] sm:$0xff]  ;;  %v255_v11 = vmax.f32 %v216_v3, %v217_v5  ;;  %v230_v14 = vadd.f32 %v217_v5, %v216_v3  ;;  %v227_v15 = vadd.f32 %v215_v7, %v214_v6  ;;  %205 = vst.msk [vmem:[#allocation2 + $0x8] sm:$0xff] %vm203_vm0, %v725_v17  ;;  %v308_v5 = vld [vmem:[%s836_s2 + $0x18] sm:$0xff] }
  0x12   : > { %259 = vmax.xlane.f32.xlu0 %v258_v4  ;;  %v249_v12 = vmax.f32 %v212_v9, %v213_v10  ;;  %v224_v16 = vadd.f32 %v213_v10, %v212_v9  ;;  %206 = vst.msk [vmem:[#allocation2 + $0x10] sm:$0xff] %vm203_vm0, %v725_v17  ;;  %v306_v3 = vld [vmem:[%s836_s2 + $0x8] sm:$0xff]  ;;  %v307_v4 = vld [vmem:[%s836_s2 + $0x10] sm:$0xff] }
  0x13   : > { %253 = vmax.xlane.f32.xlu1 %v252_v8 }
  0x14   : > { %v248_v18 = vld [vmem:[#allocation3 + $0x18] sm:$0xff]  ;;  %v245_v25 = vld [vmem:[#allocation3] sm:$0xff] }
  0x15   : > { %v246_v19 = vld [vmem:[#allocation3 + $0x8] sm:$0xff]  ;;  %v247_v23 = vld [vmem:[#allocation3 + $0x10] sm:$0xff] }
  0x16   : > { %256 = vmax.xlane.f32.xlu0 %v255_v11  ;;  %v223_v30 = vld [vmem:[#allocation2 + $0x18] sm:$0xff] }
  0x17   : > { %250 = vmax.xlane.f32.xlu1 %v249_v12  ;;  %v220_v38 = vld [vmem:[#allocation2] sm:$0xff] }
  0x18   : > { %v221_v37 = vld [vmem:[#allocation2 + $0x8] sm:$0xff] }
  0x19   : > { %v222_v31 = vld [vmem:[#allocation2 + $0x10] sm:$0xff] }
  0x1a   : > { %234 = vadd.xlane.f32.xlu0 %v233_v13 }
  0x1b   : > { %231 = vadd.xlane.f32.xlu1 %v230_v14 }
  0x1e   : > { %228 = vadd.xlane.f32.xlu0 %v227_v15 }
  0x1f   : > { %225 = vadd.xlane.f32.xlu1 %v224_v16 }
  0x9b   : > { %v260_v20 = vpop.xlane.xlu0 %259 }
  0x9c   : > { %v264_v21 = vmax.f32 %v248_v18, %v260_v20  ;;  %v254_v22 = vpop.xlane.xlu1 %253 }
  0x9d   : > { %v262_v24 = vmax.f32 %v246_v19, %v254_v22 }
  0x9e   : > { %268 = vst.msk [vmem:[#allocation3 + $0x18] sm:$0xff] %vm203_vm0, %v264_v21 }
  0x9f   : > { %v257_v26 = vpop.xlane.xlu0 %256  ;;  %266 = vst.msk [vmem:[#allocation3 + $0x8] sm:$0xff] %vm203_vm0, %v262_v24 }
  0xa0   : > { %v263_v27 = vmax.f32 %v247_v23, %v257_v26  ;;  %v251_v28 = vpop.xlane.xlu1 %250 }
  0xa1   : > { %v261_v29 = vmax.f32 %v245_v25, %v251_v28 }
  0xa2   : > { %267 = vst.msk [vmem:[#allocation3 + $0x10] sm:$0xff] %vm203_vm0, %v263_v27 }
  0xa3   : > { %265 = vst.msk [vmem:[#allocation3] sm:$0xff] %vm203_vm0, %v261_v29  ;;  %v235_v32 = vpop.xlane.xlu0 %234 }
  0xa4   : > { %v239_v33 = vadd.f32 %v235_v32, %v223_v30  ;;  %v232_v34 = vpop.xlane.xlu1 %231 }
  0xa5   : > { %v283_v35 = vld [vmem:[#allocation3 + $0x18] sm:$0xff]  ;;  %v238_v36 = vadd.f32 %v232_v34, %v222_v31 }
  0xa6   : > { %294 = vrot.lane.b32.xlu0 %v283_v35, %s726_s20  ;;  %244 = vst.msk [vmem:[#allocation2 + $0x18] sm:$0xff] %vm203_vm0, %v239_v33  ;;  %v281_v44 = vld [vmem:[#allocation3 + $0x8] sm:$0xff] }
  0xa7   : > { %243 = vst.msk [vmem:[#allocation2 + $0x10] sm:$0xff] %vm203_vm0, %v238_v36  ;;  %v229_v39 = vpop.xlane.xlu0 %228 }
  0xa8   : > { %v237_v40 = vadd.f32 %v229_v39, %v221_v37  ;;  %v226_v41 = vpop.xlane.xlu1 %225 }
  0xa9   : > { %v282_v42 = vld [vmem:[#allocation3 + $0x10] sm:$0xff]  ;;  %v236_v43 = vadd.f32 %v226_v41, %v220_v38 }
  0xaa   : > { %292 = vrot.lane.b32.xlu1 %v282_v42, %s726_s20  ;;  %242 = vst.msk [vmem:[#allocation2 + $0x8] sm:$0xff] %vm203_vm0, %v237_v40  ;;  %v280_v45 = vld [vmem:[#allocation3] sm:$0xff] }
  0xab   : > { %241 = vst.msk [vmem:[#allocation2] sm:$0xff] %vm203_vm0, %v236_v43 }
  0xad   : > { %v275_v46 = vld [vmem:[#allocation2 + $0x18] sm:$0xff] }
  0xae   : > { %290 = vrot.lane.b32.xlu1 %v281_v44, %s726_s20  ;;  %v279_v47 = vmul.f32 0.00390625, %v275_v46  ;;  %v274_v48 = vld [vmem:[#allocation2 + $0x10] sm:$0xff] }
  0xaf   : > { %v278_v51 = vmul.f32 0.00390625, %v274_v48 }
  0xb1   : > { %v273_v52 = vld [vmem:[#allocation2 + $0x8] sm:$0xff] }
  0xb2   : > { %288 = vrot.lane.b32.xlu1 %v280_v45, %s726_s20  ;;  %v277_v55 = vmul.f32 0.00390625, %v273_v52  ;;  %v272_v56 = vld [vmem:[#allocation2] sm:$0xff] }
  0xb3   : > { %v276_v59 = vmul.f32 0.00390625, %v272_v56 }
 0x118   : > { %v295_v49 = vpop.permute.xlu0 %294 }
 0x119   : > { %v303_v50 = vsel %vm203_vm0, %v279_v47, %v295_v49 }
 0x11a   : > { %637 = vmatpush3.msra.mxu0 %v303_v50 }
 0x11b   : > { %638 = vmatprep.subr.mxu0 %v725_v17 }
 0x11c   : > { %v293_v53 = vpop.permute.xlu1 %292 }
 0x11d   : > { %v302_v54 = vsel %vm203_vm0, %v278_v51, %v293_v53 }
 0x11e   : > { %639 = vmatpush3.msra.mxu0 %v302_v54 }
 0x11f   : > { %640 = vmatprep.subr.mxu0 %v725_v17 }
 0x120   : > { %v291_v57 = vpop.permute.xlu1 %290 }
 0x121   : > { %v301_v58 = vsel %vm203_vm0, %v277_v55, %v291_v57 }
 0x122   : > { %641 = vmatpush3.msra.mxu0 %v301_v58 }
 0x123   : > { %642 = vmatprep.subr.mxu0 %v725_v17 }
 0x124   : > { %v289_v60 = vpop.permute.xlu1 %288 }
 0x125   : > { %v300_v62 = vsel %vm203_vm0, %v276_v59, %v289_v60 }
 0x126   : > { %643 = vmatpush3.msra.mxu0 %v300_v62 }
 0x127   : > { %645 = vmatmul.mubr.msk.f32.vlgmr.msra.gmra.mxu0 %vm309_vm2, %v304_v61 }
 0x1e7   : > { %v379_v0 = vpop.f32.mrf.mxu0 }
 0x1e8   : > { %v383_v1 = vmax.f32 %v379_v0, 0.0 }
 0x1e9   : > { %v646_v2 = vpop.f32.mrf.mxu0 }
 0x1ea   : > { %647 = vmatprep.subr.msk.mxu1 %vm397_vm4, %v383_v1 }
 0x1eb   : > { %648 = vmatpush3.msk.msra.mxu1 %vm397_vm4, %v383_v1 }
 0x1ec   : > { %650 = vmatmul.mubr.msk.f32.vlgmr.msra.gmra.mxu1 %vm384_vm3, %v306_v3 }
 0x1ed   : > { %652 = vmatprep.mubr.msk.f32.mxu1 %vm384_vm3, %v307_v4 }
 0x1f0   : > { %653 = vmatmul.mubr.msk.f32.gmra.mxu1 %vm384_vm3, %v308_v5 }
 0x2ac   : > { %v651_v6 = vpop.f32.mrf.mxu1 }
 0x2ad   : > { %492 = vrot.lane.b32.xlu1 %v651_v6, %s728_s4 }
 0x2ae   : > { %v467_v7 = vpop.f32.mrf.mxu1 }
 0x2af   : > { %490 = vrot.lane.b32.xlu0 %v467_v7, %s728_s4 }
 0x2b0   : > { %v654_v8 = vpop.f32.mrf.mxu1 }
 0x2b1   : > { %496 = vrot.lane.b32.xlu1 %v654_v8, %s728_s4 }
 0x2b2   : > { %v477_v9 = vpop.f32.mrf.mxu1 }
 0x2b3   : > { %494 = vrot.lane.b32.xlu0 %v477_v9, %s728_s4 }
 0x31f   : > { %v493_v10 = vpop.permute.xlu1 %492 }
 0x320   : > { %v503_v11 = vadd.f32 %v651_v6, %v493_v10 }
 0x321   : > { %v491_v12 = vpop.permute.xlu0 %490 }
 0x322   : > { %v619_v13 = vmul.f32 -1.442695, %v503_v11  ;;  %v502_v14 = vadd.f32 %v491_v12, %v467_v7 }
 0x323   : > { %v497_v15 = vpop.permute.xlu1 %496 }
 0x324   : > { %684 = vpow2.f32 %v619_v13  ;;  %v618_v16 = vmul.f32 -1.442695, %v502_v14  ;;  %v505_v17 = vadd.f32 %v654_v8, %v497_v15 }
 0x325   : > { %v495_v18 = vpop.permute.xlu0 %494 }
 0x326   : > { %686 = vpow2.f32 %v618_v16  ;;  %v621_v19 = vmul.f32 -1.442695, %v505_v17  ;;  %v504_v20 = vadd.f32 %v495_v18, %v477_v9 }
 0x328   : > { %688 = vpow2.f32 %v621_v19  ;;  %v620_v21 = vmul.f32 -1.442695, %v504_v20 }
 0x32a   : > { %690 = vpow2.f32 %v620_v21 }
 0x331   : > { %v685_v22 = vpop.eup %684 }
 0x332   : > { %v519_v23 = vadd.f32 1.0, %v685_v22 }
 0x333   : > { %v687_v24 = vpop.eup %686 }
 0x334   : > { %692 = vrcp.f32 %v519_v23  ;;  %v518_v25 = vadd.f32 1.0, %v687_v24 }
 0x335   : > { %v689_v26 = vpop.eup %688 }
 0x336   : > { %694 = vrcp.f32 %v518_v25  ;;  %v521_v27 = vadd.f32 1.0, %v689_v26 }
 0x337   : > { %v691_v28 = vpop.eup %690 }
 0x338   : > { %696 = vrcp.f32 %v521_v27  ;;  %v520_v29 = vadd.f32 1.0, %v691_v28 }
 0x33a   : > { %698 = vrcp.f32 %v520_v29 }
 0x341   : > { %v693_v30 = vpop.eup %692 }
 0x342   : > { %531 = vst.msk [vmem:[%s198_s8 + $0x8] sm:$0xff] %vm203_vm0, %v693_v30 }
 0x343   : > { %v695_v31 = vpop.eup %694 }
 0x344   : > { %530 = vst.msk [vmem:[%s198_s8] sm:$0xff] %vm203_vm0, %v695_v31 }
 0x345   : > { %v697_v32 = vpop.eup %696 }
 0x346   : > { %533 = vst.msk [vmem:[%s198_s8 + $0x18] sm:$0xff] %vm203_vm0, %v697_v32 }
 0x347   : > { %v699_v33 = vpop.eup %698 }
 0x348   : > { %532 = vst.msk [vmem:[%s198_s8 + $0x10] sm:$0xff] %vm203_vm0, %v699_v33 }
 0x349 PF: > { %s13_s14 = sadd.s32 1, %s722_s14   ;;  %s838_s12 = smov %s718_s13 }
 0x34a   : > { %p10_p5 = scmp.ge.s32.totalorder %s13_s14, 4   ;;  %s839_s13 = smov %s841_s15 }
 0x34c   :  { %12 = sbr.rel (!%p10_p5) target bundleno = 2 (0x2), region = 70 }

</bundles_post_ra>
